<compile_context>
chip_gen: v7x
topology: tpu7x:2x2x1
jax: 0.10.0
libtpu: 0.0.40
codegen_flags: <defaults>
</compile_context>

<pallas_src>
import functools
import inspect

import numpy as np

import jax
import jax.numpy as jnp
from jax import lax
from jax.experimental import pallas as pl
from jax.experimental.pallas import tpu as pltpu


_MAX_KRON_K = 512          # gate for the block-diagonal pointwise expansion (W*Cin)
_MAX_ROW_TILE = 512        # rows per strip: diminishing DMA returns above this
_ACC_BYTES = 64 * 1024     # per-chunk f32 accumulator budget (~16 vregs)

_HAS_BUFFERED = hasattr(pl, "Buffered")
try:
    _HAS_PIPELINE_MODE = "pipeline_mode" in inspect.signature(pl.BlockSpec).parameters
except (TypeError, ValueError):  # pragma: no cover
    _HAS_PIPELINE_MODE = _HAS_BUFFERED


def _vmem_cap_bytes():
    """Scoped-VMEM ceiling we allow ourselves, per device generation."""
    try:
        kind = jax.devices()[0].device_kind.lower()
    except Exception:
        kind = ""
    if "v5" in kind or "v6" in kind:
        return 96 << 20      # 128 MiB physical (v5e / v6e): leave ~32 MiB headroom
    return 48 << 20          # v7x (64 MiB physical) and unknown parts: stay conservative


def _pick_row_tile(H, bytes_per_row, budget, max_rows, min_tiles):
    """Largest multiple-of-8 divisor of H whose in+out strip fits `budget`,
    preferring a choice that yields at least `min_tiles` strips (v7x: 2 TCs)."""
    cap = max(8, budget // max(bytes_per_row, 1))
    cap = min(cap, _MAX_ROW_TILE)
    if max_rows is not None:
        cap = min(cap, max_rows)
    cands = [t for t in range(8, H + 1, 8) if H % t == 0 and t <= cap]
    if not cands:
        return H   # TODO(synk): ragged last strip for H with no multiple-of-8 divisor
    multi = [t for t in cands if H // t >= min_tiles]
    return max(multi) if multi else max(cands)


def _pick_chunk(th, L):
    """Rows per accumulation chunk: multiple of 8 dividing th, f32 acc <= _ACC_BYTES."""
    if th % 8 != 0:
        return th
    cap = max(8, (_ACC_BYTES // (4 * L)) // 8 * 8)
    c = min(th, cap, 64)
    while c >= 8:
        if th % c == 0:
            return c
        c -= 8
    return th


def _dsc_kernel(x_ref, wdw_ref, pmat_ref, beff_ref, out_ref, *, cin, width, chunk):
    # x_ref    : (th+2, (W+2)*Cin)  packed row strip incl. 1-row halos & 1-px W padding
    # wdw_ref  : (9, W*Cin)         depthwise 3x3 weights, tiled per packed lane
    # pmat_ref : (W*Cin, W*Cout)    block-diagonal pointwise weight = kron(I_W, pw)
    # beff_ref : (1, W*Cout)        pointwise bias with the depthwise bias folded in
    # out_ref  : (th, W*Cout)
    th = out_ref.shape[0]
    L = width * cin
    n_chunks = th // chunk
    f32 = jnp.float32

    # Hoist the 9 per-tap weight rows and the bias row out of the chunk loop
    # (JAX does not CSE broadcast_in_dim; do these loads exactly once).
    w_taps = [wdw_ref[k:k + 1, :] for k in range(9)]       # each (1, L)
    beff = beff_ref[...]                                    # (1, Lout)

    def compute_chunk(r0):
        # Depthwise 3x3: one (chunk, Lp) load per dy, the three dx taps are static lane
        # slices of that single load.  bf16 storage is cast to f32 right after the load
        # so the VPU path stays f32 on all generations (v5e has no bf16 VALU).
        acc = jnp.zeros((chunk, L), f32)
        for dy in range(3):
            rows = x_ref[pl.ds(r0 + dy, chunk), :].astype(f32)
            for dx in range(3):
                tap = rows[:, dx * cin:dx * cin + L]
                acc = acc + tap * w_taps[3 * dy + dx]
        # Pointwise 1x1 (+ folded depthwise bias): one lane-dense MXU matmul per chunk,
        # consumed immediately -> the accumulator never round-trips through VMEM/HBM.
        y = jnp.dot(acc, pmat_ref[...], preferred_element_type=f32) + beff
        out_ref[pl.ds(r0, chunk), :] = y.astype(out_ref.dtype)

    if n_chunks <= 8:                 # short fixed trip count: unroll statically
        for c in range(n_chunks):
            compute_chunk(c * chunk)
    else:                             # long strips: keep code size bounded
        def body(c, carry):
            compute_chunk(pl.multiple_of(c * chunk, 8))
            return carry
        lax.fori_loop(0, n_chunks, body, 0)


def _pack_weights(dw_w, dw_b, pw_w, pw_b, W):
    """Pack torch-layout weights for the lane-dense packed layout (done once per W)."""
    f32 = jnp.float32
    Cin = dw_w.shape[0]
    dww = jnp.transpose(dw_w[:, 0, :, :], (1, 2, 0)).astype(f32)           # (3,3,Cin)
    wdw = jnp.tile(dww.reshape(3, 3, 1, Cin), (1, 1, W, 1)).reshape(9, W * Cin)
    pwm = jnp.transpose(pw_w[:, :, 0, 0], (1, 0)).astype(f32)              # (Cin,Cout)
    pmat = jnp.kron(jnp.eye(W, dtype=f32), pwm)                            # block-diag
    beff = jnp.tile(dw_b.astype(f32) @ pwm + pw_b.astype(f32), W).reshape(1, -1)
    return wdw, pmat, beff


@functools.partial(
    jax.jit, static_argnames=("max_rows", "storage_dtype", "single_buffer_weights"))
def _dsc_forward(x_nchw, wdw, pmat, beff, *, max_rows, storage_dtype,
                 single_buffer_weights):
    N, Cin, H, W = x_nchw.shape
    L, Lout = pmat.shape
    Cout = Lout // W
    Lp = (W + 2) * Cin
    f32 = jnp.float32

    if L != W * Cin or Lout != W * Cout:
        raise ValueError("packed weights do not match the input width/channels")
    if L > _MAX_KRON_K:
        # TODO(synk): switch to a channels-on-lanes NHWC kernel with the plain
        # (Cin, Cout) pointwise matmul for W*Cin > 512; the kron expansion below is
        # gated off (VMEM ~ W^2*Cin*Cout, MXU work inflated by W).
        raise NotImplementedError(
            f"packed-kron DSC kernel is gated to W*Cin <= {_MAX_KRON_K} (got {L})")

    sdt = np.dtype(storage_dtype)
    in_elt = sdt.itemsize
    cap = _vmem_cap_bytes()
    strip_budget = max(2 << 20, min(16 << 20, (cap - (8 << 20)) // 4))
    th = _pick_row_tile(H, Lp * in_elt + Lout * 4, strip_budget, max_rows,
                        min_tiles=2 if N == 1 else 1)
    n_tiles = H // th
    chunk = _pick_chunk(th, L)

    # ---- host-side layout glue (fused by XLA under jit): NCHW -> W-padded packed rows,
    # then overlapping (th+2)-row strips so the halos ride along with the block DMA ----
    xpad = jnp.pad(jnp.transpose(x_nchw, (0, 2, 3, 1)),
                   ((0, 0), (1, 1), (1, 1), (0, 0)))                # (N, H+2, W+2, Cin)
    rows = jnp.arange(n_tiles)[:, None] * th + jnp.arange(th + 2)[None, :]
    strips = xpad[:, rows].reshape(N, n_tiles, th + 2, Lp).astype(sdt)

    # ---- explicit VMEM budget: double-buffered activation blocks + weights + margin ---
    strip_bytes = (th + 2) * Lp * in_elt
    out_bytes = th * Lout * 4
    wgt_bytes = (9 * L + L * Lout + Lout) * 4
    wgt_factor = 1 if single_buffer_weights else 2
    vmem_limit = 2 * (strip_bytes + out_bytes) + wgt_factor * wgt_bytes + (4 << 20)
    vmem_limit = int(min(max(vmem_limit, 8 << 20), cap))

    def const_spec(shape):
        if single_buffer_weights:
            return pl.BlockSpec(shape, lambda n, i: (0, 0),
                                pipeline_mode=pl.Buffered(1))
        return pl.BlockSpec(shape, lambda n, i: (0, 0))

    kernel = functools.partial(_dsc_kernel, cin=Cin, width=W, chunk=chunk)

    out_packed = pl.pallas_call(
        kernel,
        out_shape=jax.ShapeDtypeStruct((N, H, Lout), f32),
        grid_spec=pltpu.PrefetchScalarGridSpec(
            num_scalar_prefetch=0,
            grid=(N, n_tiles),
            in_specs=[
                pl.BlockSpec((None, None, th + 2, Lp), lambda n, i: (n, i, 0, 0)),
                const_spec((9, L)),
                const_spec((L, Lout)),
                const_spec((1, Lout)),
            ],
            out_specs=pl.BlockSpec((None, th, Lout), lambda n, i: (n, i, 0)),
        ),
        compiler_params=pltpu.CompilerParams(
            dimension_semantics=("parallel", "parallel"),
            vmem_limit_bytes=vmem_limit,
        ),
    )(strips, wdw, pmat, beff)

    # Back to the torch NCHW contract.
    return jnp.transpose(out_packed.reshape(N, H, W, Cout), (0, 3, 1, 2))


class DSCPallas:
    """Forward pass of the PyTorch DSC module (depthwise 3x3 + pointwise 1x1)."""

    def __init__(self, dw_w, dw_b, pw_w, pw_b):
        self.dw_w = jnp.asarray(dw_w, jnp.float32)   # (Cin, 1, 3, 3)
        self.dw_b = jnp.asarray(dw_b, jnp.float32)   # (Cin,)
        self.pw_w = jnp.asarray(pw_w, jnp.float32)   # (Cout, Cin, 1, 1)
        self.pw_b = jnp.asarray(pw_b, jnp.float32)   # (Cout,)
        self._packed = {}                            # W -> packed weights (built once)
        self._prefer_single_buffer = _HAS_BUFFERED and _HAS_PIPELINE_MODE

    def _packed_for(self, W):
        if W not in self._packed:
            self._packed[W] = _pack_weights(self.dw_w, self.dw_b,
                                            self.pw_w, self.pw_b, W)
        return self._packed[W]

    def __call__(self, x, *, max_rows=None, storage_dtype=jnp.float32):
        wdw, pmat, beff = self._packed_for(int(x.shape[-1]))
        order = [True, False] if self._prefer_single_buffer else [False]
        last_err = None
        for sbw in order:
            try:
                out = _dsc_forward(x, wdw, pmat, beff, max_rows=max_rows,
                                   storage_dtype=np.dtype(storage_dtype),
                                   single_buffer_weights=sbw)
                self._prefer_single_buffer = sbw
                return out
            except NotImplementedError:
                raise
            except Exception as err:   # pl.Buffered(1) unsupported -> default buffering
                last_err = err
        raise last_err


def _reference(x_nchw, dw_w, dw_b, pw_w, pw_b):
    # Pure-JAX reference mirroring torch semantics (NCHW cross-correlation).
    Cin = x_nchw.shape[1]
    y = lax.conv_general_dilated(
        x_nchw, dw_w, window_strides=(1, 1), padding=((1, 1), (1, 1)),
        dimension_numbers=("NCHW", "OIHW", "NCHW"), feature_group_count=Cin)
    y = y + dw_b.reshape(1, Cin, 1, 1)
    z = lax.conv_general_dilated(
        y, pw_w, window_strides=(1, 1), padding=((0, 0), (0, 0)),
        dimension_numbers=("NCHW", "OIHW", "NCHW"))
    return z + pw_b.reshape(1, pw_w.shape[0], 1, 1)


if __name__ == "__main__":
    key = jax.random.PRNGKey(0)
    k_x, k_dw, k_dwb, k_pw, k_pwb = jax.random.split(key, 5)

    N, Cin, Cout, H, W = 2, 4, 8, 16, 16

    x = jax.random.normal(k_x, (N, Cin, H, W), dtype=jnp.float32)
    dw_w = jax.random.normal(k_dw, (Cin, 1, 3, 3), dtype=jnp.float32) * 0.1
    dw_b = jax.random.normal(k_dwb, (Cin,), dtype=jnp.float32) * 0.1
    pw_w = jax.random.normal(k_pw, (Cout, Cin, 1, 1), dtype=jnp.float32) * 0.1
    pw_b = jax.random.normal(k_pwb, (Cout,), dtype=jnp.float32) * 0.1

    ref = _reference(x, dw_w, dw_b, pw_w, pw_b)
    dsc = DSCPallas(dw_w, dw_b, pw_w, pw_b)

    # Multi-strip path (2 row strips per image: exercises the baked-in halos).
    out = jax.block_until_ready(dsc(x, max_rows=8))
    assert out.shape == (N, Cout, H, W)
    assert jnp.allclose(out, ref, atol=1e-4, rtol=1e-4), "mismatch vs reference (tiled)"

    # Default strip picking (whole image's rows in one strip at these shapes).
    out_full = jax.block_until_ready(dsc(x))
    assert jnp.allclose(out_full, ref, atol=1e-4, rtol=1e-4), "mismatch vs reference"

    # bf16 activation storage with f32 accumulation (halves strip HBM traffic).
    out_bf16 = jax.block_until_ready(dsc(x, max_rows=8, storage_dtype=jnp.bfloat16))
    assert jnp.allclose(out_bf16, ref, atol=3e-2, rtol=3e-2), "mismatch vs reference (bf16)"

    print("KERNEL_OK")
</pallas_src>

<mosaic_0001>
module attributes {stable_mosaic.version = 11 : i64} {
  func.func @_dsc_kernel(%arg0: i32, %arg1: i32, %arg2: memref<1x1x10x72xf32, #tpu.memory_space<vmem>>, %arg3: memref<9x64xf32, #tpu.memory_space<vmem>>, %arg4: memref<64x128xf32, #tpu.memory_space<vmem>>, %arg5: memref<1x128xf32, #tpu.memory_space<vmem>>, %arg6: memref<1x8x128xf32, #tpu.memory_space<vmem>>) attributes {dimension_semantics = [#tpu.dimension_semantics<parallel>, #tpu.dimension_semantics<parallel>], iteration_bounds = array<i64: 2, 2>, scalar_prefetch = 0 : i64, scratch_operands = 0 : i64, tpu.core_type = #tpu.core_type<tc>, window_params = [{transform_indices = @transform_0, window_bounds = array<i64: 1, 1, 10, 72>}, {pipeline_mode = #tpu.pipeline_mode<synchronous>, transform_indices = @transform_1, window_bounds = array<i64: 9, 64>}, {pipeline_mode = #tpu.pipeline_mode<synchronous>, transform_indices = @transform_2, window_bounds = array<i64: 64, 128>}, {pipeline_mode = #tpu.pipeline_mode<synchronous>, transform_indices = @transform_3, window_bounds = array<i64: 1, 128>}, {transform_indices = @transform_4, window_bounds = array<i64: 1, 8, 128>}]} {
    %c0 = arith.constant 0 : index
    %c0_0 = arith.constant 0 : index
    %0 = vector.load %arg3[%c0, %c0_0] : memref<9x64xf32, #tpu.memory_space<vmem>>, vector<1x64xf32>
    %c1 = arith.constant 1 : index
    %c0_1 = arith.constant 0 : index
    %1 = vector.load %arg3[%c1, %c0_1] : memref<9x64xf32, #tpu.memory_space<vmem>>, vector<1x64xf32>
    %c2 = arith.constant 2 : index
    %c0_2 = arith.constant 0 : index
    %2 = vector.load %arg3[%c2, %c0_2] : memref<9x64xf32, #tpu.memory_space<vmem>>, vector<1x64xf32>
    %c3 = arith.constant 3 : index
    %c0_3 = arith.constant 0 : index
    %3 = vector.load %arg3[%c3, %c0_3] : memref<9x64xf32, #tpu.memory_space<vmem>>, vector<1x64xf32>
    %c4 = arith.constant 4 : index
    %c0_4 = arith.constant 0 : index
    %4 = vector.load %arg3[%c4, %c0_4] : memref<9x64xf32, #tpu.memory_space<vmem>>, vector<1x64xf32>
    %c5 = arith.constant 5 : index
    %c0_5 = arith.constant 0 : index
    %5 = vector.load %arg3[%c5, %c0_5] : memref<9x64xf32, #tpu.memory_space<vmem>>, vector<1x64xf32>
    %c6 = arith.constant 6 : index
    %c0_6 = arith.constant 0 : index
    %6 = vector.load %arg3[%c6, %c0_6] : memref<9x64xf32, #tpu.memory_space<vmem>>, vector<1x64xf32>
    %c7 = arith.constant 7 : index
    %c0_7 = arith.constant 0 : index
    %7 = vector.load %arg3[%c7, %c0_7] : memref<9x64xf32, #tpu.memory_space<vmem>>, vector<1x64xf32>
    %c8 = arith.constant 8 : index
    %c0_8 = arith.constant 0 : index
    %8 = vector.load %arg3[%c8, %c0_8] : memref<9x64xf32, #tpu.memory_space<vmem>>, vector<1x64xf32>
    %c0_9 = arith.constant 0 : index
    %c0_10 = arith.constant 0 : index
    %9 = vector.load %arg5[%c0_9, %c0_10] : memref<1x128xf32, #tpu.memory_space<vmem>>, vector<1x128xf32>
    %cst = arith.constant 0.000000e+00 : f32
    %10 = vector.broadcast %cst : f32 to vector<8x64xf32>
    %c0_11 = arith.constant 0 : index
    %c0_12 = arith.constant 0 : index
    %c0_13 = arith.constant 0 : index
    %c0_14 = arith.constant 0 : index
    %11 = vector.load %arg2[%c0_11, %c0_12, %c0_13, %c0_14] : memref<1x1x10x72xf32, #tpu.memory_space<vmem>>, vector<1x1x8x72xf32>
    %12 = vector.shape_cast %11 : vector<1x1x8x72xf32> to vector<8x72xf32>
    %13 = vector.extract_strided_slice %12 {offsets = [0, 0], sizes = [8, 64], strides = [1, 1]} : vector<8x72xf32> to vector<8x64xf32>
    %14 = vector.broadcast %0 : vector<1x64xf32> to vector<8x64xf32>
    %15 = arith.mulf %13, %14 : vector<8x64xf32>
    %16 = arith.addf %10, %15 : vector<8x64xf32>
    %17 = vector.extract_strided_slice %12 {offsets = [0, 4], sizes = [8, 64], strides = [1, 1]} : vector<8x72xf32> to vector<8x64xf32>
    %18 = vector.broadcast %1 : vector<1x64xf32> to vector<8x64xf32>
    %19 = arith.mulf %17, %18 : vector<8x64xf32>
    %20 = arith.addf %16, %19 : vector<8x64xf32>
    %21 = vector.extract_strided_slice %12 {offsets = [0, 8], sizes = [8, 64], strides = [1, 1]} : vector<8x72xf32> to vector<8x64xf32>
    %22 = vector.broadcast %2 : vector<1x64xf32> to vector<8x64xf32>
    %23 = arith.mulf %21, %22 : vector<8x64xf32>
    %24 = arith.addf %20, %23 : vector<8x64xf32>
    %c0_15 = arith.constant 0 : index
    %c0_16 = arith.constant 0 : index
    %c1_17 = arith.constant 1 : index
    %c0_18 = arith.constant 0 : index
    %25 = vector.load %arg2[%c0_15, %c0_16, %c1_17, %c0_18] : memref<1x1x10x72xf32, #tpu.memory_space<vmem>>, vector<1x1x8x72xf32>
    %26 = vector.shape_cast %25 : vector<1x1x8x72xf32> to vector<8x72xf32>
    %27 = vector.extract_strided_slice %26 {offsets = [0, 0], sizes = [8, 64], strides = [1, 1]} : vector<8x72xf32> to vector<8x64xf32>
    %28 = vector.broadcast %3 : vector<1x64xf32> to vector<8x64xf32>
    %29 = arith.mulf %27, %28 : vector<8x64xf32>
    %30 = arith.addf %24, %29 : vector<8x64xf32>
    %31 = vector.extract_strided_slice %26 {offsets = [0, 4], sizes = [8, 64], strides = [1, 1]} : vector<8x72xf32> to vector<8x64xf32>
    %32 = vector.broadcast %4 : vector<1x64xf32> to vector<8x64xf32>
    %33 = arith.mulf %31, %32 : vector<8x64xf32>
    %34 = arith.addf %30, %33 : vector<8x64xf32>
    %35 = vector.extract_strided_slice %26 {offsets = [0, 8], sizes = [8, 64], strides = [1, 1]} : vector<8x72xf32> to vector<8x64xf32>
    %36 = vector.broadcast %5 : vector<1x64xf32> to vector<8x64xf32>
    %37 = arith.mulf %35, %36 : vector<8x64xf32>
    %38 = arith.addf %34, %37 : vector<8x64xf32>
    %c0_19 = arith.constant 0 : index
    %c0_20 = arith.constant 0 : index
    %c2_21 = arith.constant 2 : index
    %c0_22 = arith.constant 0 : index
    %39 = vector.load %arg2[%c0_19, %c0_20, %c2_21, %c0_22] : memref<1x1x10x72xf32, #tpu.memory_space<vmem>>, vector<1x1x8x72xf32>
    %40 = vector.shape_cast %39 : vector<1x1x8x72xf32> to vector<8x72xf32>
    %41 = vector.extract_strided_slice %40 {offsets = [0, 0], sizes = [8, 64], strides = [1, 1]} : vector<8x72xf32> to vector<8x64xf32>
    %42 = vector.broadcast %6 : vector<1x64xf32> to vector<8x64xf32>
    %43 = arith.mulf %41, %42 : vector<8x64xf32>
    %44 = arith.addf %38, %43 : vector<8x64xf32>
    %45 = vector.extract_strided_slice %40 {offsets = [0, 4], sizes = [8, 64], strides = [1, 1]} : vector<8x72xf32> to vector<8x64xf32>
    %46 = vector.broadcast %7 : vector<1x64xf32> to vector<8x64xf32>
    %47 = arith.mulf %45, %46 : vector<8x64xf32>
    %48 = arith.addf %44, %47 : vector<8x64xf32>
    %49 = vector.extract_strided_slice %40 {offsets = [0, 8], sizes = [8, 64], strides = [1, 1]} : vector<8x72xf32> to vector<8x64xf32>
    %50 = vector.broadcast %8 : vector<1x64xf32> to vector<8x64xf32>
    %51 = arith.mulf %49, %50 : vector<8x64xf32>
    %52 = arith.addf %48, %51 : vector<8x64xf32>
    %c0_23 = arith.constant 0 : index
    %c0_24 = arith.constant 0 : index
    %53 = vector.load %arg4[%c0_23, %c0_24] : memref<64x128xf32, #tpu.memory_space<vmem>>, vector<64x128xf32>
    %cst_25 = arith.constant dense<0.000000e+00> : vector<8x128xf32>
    %54 = tpu.matmul %52, %53, %cst_25 {dimension_numbers = #tpu.dot_dimension_numbers<[1], [0], [0], [1], [0, 0, 1, 1], [], []>} : vector<8x64xf32>, vector<64x128xf32>, vector<8x128xf32> -> vector<8x128xf32>
    %55 = vector.broadcast %9 : vector<1x128xf32> to vector<8x128xf32>
    %56 = arith.addf %54, %55 : vector<8x128xf32>
    %c0_26 = arith.constant 0 : index
    %c0_27 = arith.constant 0 : index
    %c0_28 = arith.constant 0 : index
    %57 = vector.load %arg6[%c0_26, %c0_27, %c0_28] : memref<1x8x128xf32, #tpu.memory_space<vmem>>, vector<1x8x128xf32>
    %58 = vector.shape_cast %57 : vector<1x8x128xf32> to vector<8x128xf32>
    %59 = vector.shape_cast %56 : vector<8x128xf32> to vector<1x8x128xf32>
    tpu.vector_store %arg6[%c0_26, %c0_27, %c0_28], %59 {strides = array<i32>} : memref<1x8x128xf32, #tpu.memory_space<vmem>>, vector<1x8x128xf32>,
    return
  }
  func.func @transform_0(%arg0: i32, %arg1: i32) -> (i32, i32, i32, i32) {
    %c0_i32 = arith.constant 0 : i32
    %c0_i32_0 = arith.constant 0 : i32
    %c0_i32_1 = arith.constant 0 : i32
    return %arg0, %arg1, %c0_i32, %c0_i32_0 : i32, i32, i32, i32
  }
  func.func @transform_1(%arg0: i32, %arg1: i32) -> (i32, i32) {
    %c0_i32 = arith.constant 0 : i32
    %c0_i32_0 = arith.constant 0 : i32
    %c0_i32_1 = arith.constant 0 : i32
    return %c0_i32, %c0_i32_0 : i32, i32
  }
  func.func @transform_2(%arg0: i32, %arg1: i32) -> (i32, i32) {
    %c0_i32 = arith.constant 0 : i32
    %c0_i32_0 = arith.constant 0 : i32
    %c0_i32_1 = arith.constant 0 : i32
    return %c0_i32, %c0_i32_0 : i32, i32
  }
  func.func @transform_3(%arg0: i32, %arg1: i32) -> (i32, i32) {
    %c0_i32 = arith.constant 0 : i32
    %c0_i32_0 = arith.constant 0 : i32
    %c0_i32_1 = arith.constant 0 : i32
    return %c0_i32, %c0_i32_0 : i32, i32
  }
  func.func @transform_4(%arg0: i32, %arg1: i32) -> (i32, i32, i32) {
    %c0_i32 = arith.constant 0 : i32
    %c0_i32_0 = arith.constant 0 : i32
    return %arg0, %arg1, %c0_i32 : i32, i32, i32
  }
}

module attributes {stable_mosaic.version = 11 : i64} {
  func.func @_dsc_kernel(%arg0: i32, %arg1: i32, %arg2: memref<1x1x10x72xf32, #tpu.memory_space<vmem>>, %arg3: memref<9x64xf32, #tpu.memory_space<vmem>>, %arg4: memref<64x128xf32, #tpu.memory_space<vmem>>, %arg5: memref<1x128xf32, #tpu.memory_space<vmem>>, %arg6: memref<1x8x128xf32, #tpu.memory_space<vmem>>) attributes {dimension_semantics = [#tpu.dimension_semantics<parallel>, #tpu.dimension_semantics<parallel>], iteration_bounds = array<i64: 2, 2>, scalar_prefetch = 0 : i64, scratch_operands = 0 : i64, tpu.core_type = #tpu.core_type<tc>, window_params = [{transform_indices = @transform_0, window_bounds = array<i64: 1, 1, 10, 72>}, {pipeline_mode = #tpu.pipeline_mode<synchronous>, transform_indices = @transform_1, window_bounds = array<i64: 9, 64>}, {pipeline_mode = #tpu.pipeline_mode<synchronous>, transform_indices = @transform_2, window_bounds = array<i64: 64, 128>}, {pipeline_mode = #tpu.pipeline_mode<synchronous>, transform_indices = @transform_3, window_bounds = array<i64: 1, 128>}, {transform_indices = @transform_4, window_bounds = array<i64: 1, 8, 128>}]} {
    %c0 = arith.constant 0 : index
    %c0_0 = arith.constant 0 : index
    %0 = vector.load %arg3[%c0, %c0_0] : memref<9x64xf32, #tpu.memory_space<vmem>>, vector<1x64xf32>
    %c1 = arith.constant 1 : index
    %c0_1 = arith.constant 0 : index
    %1 = vector.load %arg3[%c1, %c0_1] : memref<9x64xf32, #tpu.memory_space<vmem>>, vector<1x64xf32>
    %c2 = arith.constant 2 : index
    %c0_2 = arith.constant 0 : index
    %2 = vector.load %arg3[%c2, %c0_2] : memref<9x64xf32, #tpu.memory_space<vmem>>, vector<1x64xf32>
    %c3 = arith.constant 3 : index
    %c0_3 = arith.constant 0 : index
    %3 = vector.load %arg3[%c3, %c0_3] : memref<9x64xf32, #tpu.memory_space<vmem>>, vector<1x64xf32>
    %c4 = arith.constant 4 : index
    %c0_4 = arith.constant 0 : index
    %4 = vector.load %arg3[%c4, %c0_4] : memref<9x64xf32, #tpu.memory_space<vmem>>, vector<1x64xf32>
    %c5 = arith.constant 5 : index
    %c0_5 = arith.constant 0 : index
    %5 = vector.load %arg3[%c5, %c0_5] : memref<9x64xf32, #tpu.memory_space<vmem>>, vector<1x64xf32>
    %c6 = arith.constant 6 : index
    %c0_6 = arith.constant 0 : index
    %6 = vector.load %arg3[%c6, %c0_6] : memref<9x64xf32, #tpu.memory_space<vmem>>, vector<1x64xf32>
    %c7 = arith.constant 7 : index
    %c0_7 = arith.constant 0 : index
    %7 = vector.load %arg3[%c7, %c0_7] : memref<9x64xf32, #tpu.memory_space<vmem>>, vector<1x64xf32>
    %c8 = arith.constant 8 : index
    %c0_8 = arith.constant 0 : index
    %8 = vector.load %arg3[%c8, %c0_8] : memref<9x64xf32, #tpu.memory_space<vmem>>, vector<1x64xf32>
    %c0_9 = arith.constant 0 : index
    %c0_10 = arith.constant 0 : index
    %9 = vector.load %arg5[%c0_9, %c0_10] : memref<1x128xf32, #tpu.memory_space<vmem>>, vector<1x128xf32>
    %cst = arith.constant 0.000000e+00 : f32
    %10 = vector.broadcast %cst : f32 to vector<8x64xf32>
    %c0_11 = arith.constant 0 : index
    %c0_12 = arith.constant 0 : index
    %c0_13 = arith.constant 0 : index
    %c0_14 = arith.constant 0 : index
    %11 = vector.load %arg2[%c0_11, %c0_12, %c0_13, %c0_14] : memref<1x1x10x72xf32, #tpu.memory_space<vmem>>, vector<1x1x8x72xf32>
    %12 = vector.shape_cast %11 : vector<1x1x8x72xf32> to vector<8x72xf32>
    %13 = vector.extract_strided_slice %12 {offsets = [0, 0], sizes = [8, 64], strides = [1, 1]} : vector<8x72xf32> to vector<8x64xf32>
    %14 = vector.broadcast %0 : vector<1x64xf32> to vector<8x64xf32>
    %15 = arith.mulf %13, %14 : vector<8x64xf32>
    %16 = arith.addf %10, %15 : vector<8x64xf32>
    %17 = vector.extract_strided_slice %12 {offsets = [0, 4], sizes = [8, 64], strides = [1, 1]} : vector<8x72xf32> to vector<8x64xf32>
    %18 = vector.broadcast %1 : vector<1x64xf32> to vector<8x64xf32>
    %19 = arith.mulf %17, %18 : vector<8x64xf32>
    %20 = arith.addf %16, %19 : vector<8x64xf32>
    %21 = vector.extract_strided_slice %12 {offsets = [0, 8], sizes = [8, 64], strides = [1, 1]} : vector<8x72xf32> to vector<8x64xf32>
    %22 = vector.broadcast %2 : vector<1x64xf32> to vector<8x64xf32>
    %23 = arith.mulf %21, %22 : vector<8x64xf32>
    %24 = arith.addf %20, %23 : vector<8x64xf32>
    %c0_15 = arith.constant 0 : index
    %c0_16 = arith.constant 0 : index
    %c1_17 = arith.constant 1 : index
    %c0_18 = arith.constant 0 : index
    %25 = vector.load %arg2[%c0_15, %c0_16, %c1_17, %c0_18] : memref<1x1x10x72xf32, #tpu.memory_space<vmem>>, vector<1x1x8x72xf32>
    %26 = vector.shape_cast %25 : vector<1x1x8x72xf32> to vector<8x72xf32>
    %27 = vector.extract_strided_slice %26 {offsets = [0, 0], sizes = [8, 64], strides = [1, 1]} : vector<8x72xf32> to vector<8x64xf32>
    %28 = vector.broadcast %3 : vector<1x64xf32> to vector<8x64xf32>
    %29 = arith.mulf %27, %28 : vector<8x64xf32>
    %30 = arith.addf %24, %29 : vector<8x64xf32>
    %31 = vector.extract_strided_slice %26 {offsets = [0, 4], sizes = [8, 64], strides = [1, 1]} : vector<8x72xf32> to vector<8x64xf32>
    %32 = vector.broadcast %4 : vector<1x64xf32> to vector<8x64xf32>
    %33 = arith.mulf %31, %32 : vector<8x64xf32>
    %34 = arith.addf %30, %33 : vector<8x64xf32>
    %35 = vector.extract_strided_slice %26 {offsets = [0, 8], sizes = [8, 64], strides = [1, 1]} : vector<8x72xf32> to vector<8x64xf32>
    %36 = vector.broadcast %5 : vector<1x64xf32> to vector<8x64xf32>
    %37 = arith.mulf %35, %36 : vector<8x64xf32>
    %38 = arith.addf %34, %37 : vector<8x64xf32>
    %c0_19 = arith.constant 0 : index
    %c0_20 = arith.constant 0 : index
    %c2_21 = arith.constant 2 : index
    %c0_22 = arith.constant 0 : index
    %39 = vector.load %arg2[%c0_19, %c0_20, %c2_21, %c0_22] : memref<1x1x10x72xf32, #tpu.memory_space<vmem>>, vector<1x1x8x72xf32>
    %40 = vector.shape_cast %39 : vector<1x1x8x72xf32> to vector<8x72xf32>
    %41 = vector.extract_strided_slice %40 {offsets = [0, 0], sizes = [8, 64], strides = [1, 1]} : vector<8x72xf32> to vector<8x64xf32>
    %42 = vector.broadcast %6 : vector<1x64xf32> to vector<8x64xf32>
    %43 = arith.mulf %41, %42 : vector<8x64xf32>
    %44 = arith.addf %38, %43 : vector<8x64xf32>
    %45 = vector.extract_strided_slice %40 {offsets = [0, 4], sizes = [8, 64], strides = [1, 1]} : vector<8x72xf32> to vector<8x64xf32>
    %46 = vector.broadcast %7 : vector<1x64xf32> to vector<8x64xf32>
    %47 = arith.mulf %45, %46 : vector<8x64xf32>
    %48 = arith.addf %44, %47 : vector<8x64xf32>
    %49 = vector.extract_strided_slice %40 {offsets = [0, 8], sizes = [8, 64], strides = [1, 1]} : vector<8x72xf32> to vector<8x64xf32>
    %50 = vector.broadcast %8 : vector<1x64xf32> to vector<8x64xf32>
    %51 = arith.mulf %49, %50 : vector<8x64xf32>
    %52 = arith.addf %48, %51 : vector<8x64xf32>
    %c0_23 = arith.constant 0 : index
    %c0_24 = arith.constant 0 : index
    %53 = vector.load %arg4[%c0_23, %c0_24] : memref<64x128xf32, #tpu.memory_space<vmem>>, vector<64x128xf32>
    %cst_25 = arith.constant dense<0.000000e+00> : vector<8x128xf32>
    %54 = tpu.matmul %52, %53, %cst_25 {dimension_numbers = #tpu.dot_dimension_numbers<[1], [0], [0], [1], [0, 0, 1, 1], [], []>} : vector<8x64xf32>, vector<64x128xf32>, vector<8x128xf32> -> vector<8x128xf32>
    %55 = vector.broadcast %9 : vector<1x128xf32> to vector<8x128xf32>
    %56 = arith.addf %54, %55 : vector<8x128xf32>
    %c0_26 = arith.constant 0 : index
    %c0_27 = arith.constant 0 : index
    %c0_28 = arith.constant 0 : index
    %57 = vector.load %arg6[%c0_26, %c0_27, %c0_28] : memref<1x8x128xf32, #tpu.memory_space<vmem>>, vector<1x8x128xf32>
    %58 = vector.shape_cast %57 : vector<1x8x128xf32> to vector<8x128xf32>
    %59 = vector.shape_cast %56 : vector<8x128xf32> to vector<1x8x128xf32>
    tpu.vector_store %arg6[%c0_26, %c0_27, %c0_28], %59 {strides = array<i32>} : memref<1x8x128xf32, #tpu.memory_space<vmem>>, vector<1x8x128xf32>,
    return
  }
  func.func @transform_0(%arg0: i32, %arg1: i32) -> (i32, i32, i32, i32) {
    %c0_i32 = arith.constant 0 : i32
    %c0_i32_0 = arith.constant 0 : i32
    %c0_i32_1 = arith.constant 0 : i32
    return %arg0, %arg1, %c0_i32, %c0_i32_0 : i32, i32, i32, i32
  }
  func.func @transform_1(%arg0: i32, %arg1: i32) -> (i32, i32) {
    %c0_i32 = arith.constant 0 : i32
    %c0_i32_0 = arith.constant 0 : i32
    %c0_i32_1 = arith.constant 0 : i32
    return %c0_i32, %c0_i32_0 : i32, i32
  }
  func.func @transform_2(%arg0: i32, %arg1: i32) -> (i32, i32) {
    %c0_i32 = arith.constant 0 : i32
    %c0_i32_0 = arith.constant 0 : i32
    %c0_i32_1 = arith.constant 0 : i32
    return %c0_i32, %c0_i32_0 : i32, i32
  }
  func.func @transform_3(%arg0: i32, %arg1: i32) -> (i32, i32) {
    %c0_i32 = arith.constant 0 : i32
    %c0_i32_0 = arith.constant 0 : i32
    %c0_i32_1 = arith.constant 0 : i32
    return %c0_i32, %c0_i32_0 : i32, i32
  }
  func.func @transform_4(%arg0: i32, %arg1: i32) -> (i32, i32, i32) {
    %c0_i32 = arith.constant 0 : i32
    %c0_i32_0 = arith.constant 0 : i32
    return %arg0, %arg1, %c0_i32 : i32, i32, i32
  }
}

</mosaic_0001>

<bundles_post_ra>
// kernel: _dsc_forward.1
= control target key start
LH: loop header
LB: loop body
LE: loop exit
PB: predicated region body
PF: predicated region fallthrough
CT: control target
= control target key end

     0   :  { %s707_s15 = smov 0   ;;  %s709_s16 = smov 0   ;;  %s828_s0 = inlined_call_operand.vmem [shape: f32[2,2,10,72], index: 0, kind: input, shape index: {}]   ;;  %s829_s1 = inlined_call_operand.vmem [shape: f32[9,64], index: 1, kind: input, shape index: {}]   ;;  %s830_s2 = inlined_call_operand.vmem [shape: f32[64,128], index: 2, kind: input, shape index: {}]   ;;  %s831_s3 = inlined_call_operand.vmem [shape: f32[1,128], index: 3, kind: input, shape index: {}]   ;;  %s832_s4 = inlined_call_operand.vmem [shape: f32[2,16,128], index: 4, kind: output, shape index: {}]  }
   0x1   :  { %s711_s17 = smov 0   ;;  %s713_s18 = smov 0  }
   0x2   :  { %s715_s19 = smov 0  }
   0x3 LB: > { %s23_s20 = sadd.s32 1, %s665_s17  ;;  %s26_s21 = sadd.s32 1, %s669_s18  ;;  %s673_s19 = sphi %s715_s19, %s14_s19   ;;  %s669_s18 = sphi %s713_s18, %s836_s18   ;;  %s665_s17 = sphi %s711_s17, %s835_s17   ;;  %s661_s16 = sphi %s709_s16, %s834_s16   ;;  %s657_s15 = sphi %s707_s15, %s833_s15  }
   0x4   : > { %p24_p0 = scmp.ge.s32.totalorder %s23_s20, 2  ;;  %p529_p1 = scmp.ge.s32.totalorder %s673_s19, 1 }
   0x5   : > { %p182_p2 = scmp.lt.s32.totalorder %s673_s19, 5 }
   0x6   : > { %s838_s20 = smov (%p24_p0, %s23_s20), 0  ;;  %s840_s21 = smov (!%p24_p0, %s26_s21), %s669_s18 }
   0x7   : > { %p183_p3 = pnand %p529_p1, %p182_p2  ;;  %p28_p4 = scmp.ge.s32.totalorder %s840_s21, 2 }
   0x8   : > { %v536_v0 = vld [vmem:[%s829_s1 + $0x1] ss:$0 sm:$0xff] (!%p183_p3)  ;;  %s675_s24 = smov (!%p183_p3), 4   ;;  %v539_v1 = vld [vmem:[%s829_s1 + $0x4] ss:$0 sm:$0xff] (!%p183_p3)  ;;  %s676_s5 = smov (!%p183_p3), 8  }
   0x9   : > { %s842_s21 = smov (%p28_p4, %s840_s21), 0  ;;  %186 = sbr.rel (%p183_p3) target bundleno = 475 (0x1db), region = 36 }
   0xa   : > { %254 = vrot.lane.b32.xlu0 (!%p183_p3), %v536_v0, %s675_s24  ;;  %v537_v2 = vld [vmem:[%s829_s1 + $0x2] ss:$0 sm:$0xff] (!%p183_p3)  ;;  %289 = vrot.lane.b32.xlu1 (!%p183_p3), %v539_v1, %s675_s24  ;;  %v540_v3 = vld [vmem:[%s829_s1 + $0x5] ss:$0 sm:$0xff] (!%p183_p3)  ;;  %p215_p5 = scmp.lt.s32.totalorder (!%p183_p3), %s661_s16, 1  ;;  %p217_p6 = scmp.lt.s32.totalorder (!%p183_p3), %s657_s15, 1 }
   0xb   : > { %v542_v4 = vld [vmem:[%s829_s1 + $0x7] ss:$0 sm:$0xff] (!%p183_p3)  ;;  %v543_v5 = vld [vmem:[%s829_s1 + $0x8] ss:$0 sm:$0xff] (!%p183_p3)  ;;  %v677_v8 = vmov (!%p183_p3), 0.0|0.0   ;;  %v349_v10 = vld [vmem:[%s830_s2 + $0x10] sm:$0xff] (!%p183_p3) }
   0xc   : > { %v347_v6 = vld [vmem:[%s830_s2] sm:$0xff] (!%p183_p3)  ;;  %v348_v7 = vld [vmem:[%s830_s2 + $0x8] sm:$0xff] (!%p183_p3)  ;;  %576 = vmatprep.subr.bf16.mxu0 (!%p183_p3), %v677_v8  ;;  %v350_v11 = vld [vmem:[%s830_s2 + $0x18] sm:$0xff] (!%p183_p3)  ;;  %s678_s14 = smov (!%p183_p3), 124   ;;  %s679_s22 = smov (!%p183_p3), 120   ;;  %vm680_vm0 = vmmov (!%p183_p3), 0  }
   0xd   : > { %v577_v9 = vpack.c.bf16 (!%p183_p3), %v348_v7, %v347_v6  ;;  %v580_v12 = vpack.c.bf16 (!%p183_p3), %v350_v11, %v349_v10  ;;  %v351_v14 = vld [vmem:[%s830_s2 + $0x20] sm:$0xff] (!%p183_p3)  ;;  %v352_v15 = vld [vmem:[%s830_s2 + $0x28] sm:$0xff] (!%p183_p3)  ;;  %v353_v21 = vld [vmem:[%s830_s2 + $0x30] sm:$0xff] (!%p183_p3)  ;;  %v681_v31 = vmov (!%p183_p3), 0.0   ;;  %vm361_vm1 = vcmask (!%p183_p3), 523264  }
   0xe   : > { %268 = vrot.lane.b32.xlu0 (!%p183_p3), %v537_v2, %s676_s5  ;;  %303 = vrot.lane.b32.xlu1 (!%p183_p3), %v540_v3, %s676_s5  ;;  %v583_v16 = vpack.c.bf16 (!%p183_p3), %v352_v15, %v351_v14  ;;  %v354_v22 = vld [vmem:[%s830_s2 + $0x38] sm:$0xff] (!%p183_p3)  ;;  %v535_v35 = vld [vmem:[%s829_s1] ss:$0 sm:$0xff] (!%p183_p3) }
   0xf   : > { %578 = vmatpush3.bf16.msra.mxu0 (!%p183_p3), %v577_v9  ;;  %v586_v24 = vpack.c.bf16 (!%p183_p3), %v354_v22, %v353_v21  ;;  %573 = vmatprep.mubr.msk.f32.mxu0 (!%p183_p3), %vm680_vm0, %v681_v31  ;;  %v538_v38 = vld [vmem:[%s829_s1 + $0x3] ss:$0 sm:$0xff] (!%p183_p3)  ;;  %v541_v43 = vld [vmem:[%s829_s1 + $0x6] ss:$0 sm:$0xff] (!%p183_p3)  ;;  %v544_v55 = vld [vmem:[%s831_s3] ss:$0 sm:$0xff] (!%p183_p3) }
  0x10   : > { %s844_s16 = smov (!%p215_p5, %s661_s16), 1  ;;  %s846_s15 = smov (!%p217_p6, %s657_s15), 1  ;;  %579 = vmatprep.subr.bf16.mxu0 %v677_v8 }
  0x11   : > { %s530_s10 = sshll.u32 %s846_s15, 1  ;;  %s531_s11 = sshll.u32 %s844_s16, 2 }
  0x12   : > { %324 = vrot.lane.b32.xlu0 %v542_v4, %s675_s24  ;;  %338 = vrot.lane.b32.xlu1 %v543_v5, %s676_s5  ;;  %s221_s12 = sadd.s32 %s531_s11, %s530_s10  ;;  %s533_s29 = sshll.u32 %s844_s16, 1 }
  0x13   : > { %s532_s24 = sshll.u32 %s221_s12, 3  ;;  %581 = vmatpush3.bf16.msra.mxu0 %v580_v12  ;;  %s229_s30 = sadd.s32 %s533_s29, %s846_s15 }
  0x14   : > { %s223_s5 = scalar_lea.vmem %s828_s0, %s532_s24  ;;  %582 = vmatprep.subr.bf16.mxu0 %v677_v8 }
  0x15   : > { %v242_v13 = vld [vmem:[%s223_s5] sm:$0xff] }
  0x16   : > { %v277_v18 = vld [vmem:[%s223_s5 + $0x1] sm:$0xff]  ;;  %v247_v36 = vmul.f32 %v535_v35, %v242_v13 }
  0x17   : > { %584 = vmatpush3.bf16.msra.mxu0 %v583_v16  ;;  %v312_v28 = vld [vmem:[%s223_s5 + $0x2] sm:$0xff]  ;;  %v282_v40 = vmul.f32 %v538_v38, %v277_v18  ;;  %s534_s5 = sshll.u32 %s229_s30, 3 }
  0x18   : > { %585 = vmatprep.subr.bf16.mxu0 %v677_v8  ;;  %v317_v48 = vmul.f32 %v541_v43, %v312_v28  ;;  %s231_s10 = scalar_lea.vmem %s832_s4, %s534_s5 }
  0x1b   : > { %587 = vmatpush3.bf16.msra.mxu0 %v586_v24 }
  0x7c   : > { %v255_v17 = vpop.permute.xlu0 %254  ;;  %v290_v20 = vpop.permute.xlu1 %289 }
  0x7d   : > { %v257_v19 = vmul.f32 %v255_v17, %v242_v13  ;;  %v292_v23 = vmul.f32 %v290_v20, %v277_v18 }
  0x7f   : > { %259 = vrot.lane.b32.xlu0 %v257_v19, %s678_s14 }
  0x80   : > { %v269_v25 = vpop.permute.xlu0 %268  ;;  %v304_v27 = vpop.permute.xlu1 %303 }
  0x81   : > { %v271_v26 = vmul.f32 %v269_v25, %v242_v13  ;;  %v306_v29 = vmul.f32 %v304_v27, %v277_v18 }
  0x83   : > { %273 = vrot.lane.b32.xlu1 %v271_v26, %s679_s22  ;;  %294 = vrot.lane.b32.xlu0 %v292_v23, %s678_s14 }
  0x84   : > { %v325_v30 = vpop.permute.xlu0 %324  ;;  %v339_v33 = vpop.permute.xlu1 %338 }
  0x85   : > { %v327_v32 = vmul.f32 %v325_v30, %v312_v28  ;;  %v341_v34 = vmul.f32 %v339_v33, %v312_v28 }
  0x87   : > { %308 = vrot.lane.b32.xlu1 %v306_v29, %s679_s22  ;;  %329 = vrot.lane.b32.xlu0 %v327_v32, %s678_s14 }
  0x8b   : > { %343 = vrot.lane.b32.xlu1 %v341_v34, %s679_s22 }
  0xf1   : > { %v260_v37 = vpop.permute.xlu0 %259 }
  0xf2   : > { %v262_v39 = vadd.f32 %v260_v37, %v247_v36 }
  0xf5   : > { %v274_v41 = vpop.permute.xlu1 %273  ;;  %v295_v45 = vpop.permute.xlu0 %294 }
  0xf6   : > { %v276_v42 = vadd.f32 %v274_v41, %v262_v39 }
  0xf8   : > { %v283_v44 = vadd.f32 %v282_v40, %v276_v42 }
  0xf9   : > { %v309_v46 = vpop.permute.xlu1 %308  ;;  %v330_v50 = vpop.permute.xlu0 %329 }
  0xfa   : > { %v297_v47 = vadd.f32 %v295_v45, %v283_v44 }
  0xfc   : > { %v311_v49 = vadd.f32 %v309_v46, %v297_v47 }
  0xfd   : > { %v344_v52 = vpop.permute.xlu1 %343 }
  0xfe   : > { %v318_v51 = vadd.f32 %v317_v48, %v311_v49 }
 0x100   : > { %v332_v53 = vadd.f32 %v330_v50, %v318_v51 }
 0x102   : > { %v346_v54 = vadd.f32 %v344_v52, %v332_v53 }
 0x104   : > { %574 = vmatmul.mubr.msk.f32.vlgmr.msra.gmra.mrb[0].mxu0 %vm361_vm1, %v346_v54 }
 0x1d7   : > { %v431_v56 = vpop.f32.mrb[0].mxu0 }
 0x1d8   : > { %v432_v57 = vadd.f32 %v544_v55, %v431_v56  ;;  %v575_v58 = vpop.f32.mrb[1].mxu0 }
 0x1da   : > { %435 = vst [vmem:[%s231_s10] sm:$0xff] %v432_v57 }
 0x1db PF: > { %s14_s19 = sadd.s32 1, %s673_s19   ;;  %s833_s15 = smov %s665_s17 }
 0x1dc   : > { %p11_p7 = scmp.ge.s32.totalorder %s14_s19, 6   ;;  %s834_s16 = smov %s669_s18 }
 0x1dd   : > { %s835_s17 = smov %s838_s20  ;;  %s836_s18 = smov %s842_s21 }
 0x1de   :  { %13 = sbr.rel (!%p11_p7) target bundleno = 3 (0x3), region = 66 }

// kernel: _dsc_forward.1
= control target key start
LH: loop header
LB: loop body
LE: loop exit
PB: predicated region body
PF: predicated region fallthrough
CT: control target
= control target key end

     0   :  { %s707_s15 = smov 0   ;;  %s709_s16 = smov 0   ;;  %s828_s0 = inlined_call_operand.vmem [shape: f32[2,2,10,72], index: 0, kind: input, shape index: {}]   ;;  %s829_s1 = inlined_call_operand.vmem [shape: f32[9,64], index: 1, kind: input, shape index: {}]   ;;  %s830_s2 = inlined_call_operand.vmem [shape: f32[64,128], index: 2, kind: input, shape index: {}]   ;;  %s831_s3 = inlined_call_operand.vmem [shape: f32[1,128], index: 3, kind: input, shape index: {}]   ;;  %s832_s4 = inlined_call_operand.vmem [shape: f32[2,16,128], index: 4, kind: output, shape index: {}]  }
   0x1   :  { %s711_s17 = smov 0   ;;  %s713_s18 = smov 0  }
   0x2   :  { %s715_s19 = smov 0  }
   0x3 LB: > { %s23_s20 = sadd.s32 1, %s665_s17  ;;  %s26_s21 = sadd.s32 1, %s669_s18  ;;  %s673_s19 = sphi %s715_s19, %s14_s19   ;;  %s669_s18 = sphi %s713_s18, %s836_s18   ;;  %s665_s17 = sphi %s711_s17, %s835_s17   ;;  %s661_s16 = sphi %s709_s16, %s834_s16   ;;  %s657_s15 = sphi %s707_s15, %s833_s15  }
   0x4   : > { %p24_p0 = scmp.ge.s32.totalorder %s23_s20, 2  ;;  %p529_p1 = scmp.ge.s32.totalorder %s673_s19, 1 }
   0x5   : > { %p182_p2 = scmp.lt.s32.totalorder %s673_s19, 5 }
   0x6   : > { %s838_s20 = smov (%p24_p0, %s23_s20), 0  ;;  %s840_s21 = smov (!%p24_p0, %s26_s21), %s669_s18 }
   0x7   : > { %p183_p3 = pnand %p529_p1, %p182_p2  ;;  %p28_p4 = scmp.ge.s32.totalorder %s840_s21, 2 }
   0x8   : > { %v536_v0 = vld [vmem:[%s829_s1 + $0x1] ss:$0 sm:$0xff] (!%p183_p3)  ;;  %s675_s24 = smov (!%p183_p3), 4   ;;  %v539_v1 = vld [vmem:[%s829_s1 + $0x4] ss:$0 sm:$0xff] (!%p183_p3)  ;;  %s676_s5 = smov (!%p183_p3), 8  }
   0x9   : > { %s842_s21 = smov (%p28_p4, %s840_s21), 0  ;;  %186 = sbr.rel (%p183_p3) target bundleno = 475 (0x1db), region = 36 }
   0xa   : > { %254 = vrot.lane.b32.xlu0 (!%p183_p3), %v536_v0, %s675_s24  ;;  %v537_v2 = vld [vmem:[%s829_s1 + $0x2] ss:$0 sm:$0xff] (!%p183_p3)  ;;  %289 = vrot.lane.b32.xlu1 (!%p183_p3), %v539_v1, %s675_s24  ;;  %v540_v3 = vld [vmem:[%s829_s1 + $0x5] ss:$0 sm:$0xff] (!%p183_p3)  ;;  %p215_p5 = scmp.lt.s32.totalorder (!%p183_p3), %s661_s16, 1  ;;  %p217_p6 = scmp.lt.s32.totalorder (!%p183_p3), %s657_s15, 1 }
   0xb   : > { %v542_v4 = vld [vmem:[%s829_s1 + $0x7] ss:$0 sm:$0xff] (!%p183_p3)  ;;  %v543_v5 = vld [vmem:[%s829_s1 + $0x8] ss:$0 sm:$0xff] (!%p183_p3)  ;;  %v677_v8 = vmov (!%p183_p3), 0.0|0.0   ;;  %v349_v10 = vld [vmem:[%s830_s2 + $0x10] sm:$0xff] (!%p183_p3) }
   0xc   : > { %v347_v6 = vld [vmem:[%s830_s2] sm:$0xff] (!%p183_p3)  ;;  %v348_v7 = vld [vmem:[%s830_s2 + $0x8] sm:$0xff] (!%p183_p3)  ;;  %576 = vmatprep.subr.bf16.mxu0 (!%p183_p3), %v677_v8  ;;  %v350_v11 = vld [vmem:[%s830_s2 + $0x18] sm:$0xff] (!%p183_p3)  ;;  %s678_s14 = smov (!%p183_p3), 124   ;;  %s679_s22 = smov (!%p183_p3), 120   ;;  %vm680_vm0 = vmmov (!%p183_p3), 0  }
   0xd   : > { %v577_v9 = vpack.c.bf16 (!%p183_p3), %v348_v7, %v347_v6  ;;  %v580_v12 = vpack.c.bf16 (!%p183_p3), %v350_v11, %v349_v10  ;;  %v351_v14 = vld [vmem:[%s830_s2 + $0x20] sm:$0xff] (!%p183_p3)  ;;  %v352_v15 = vld [vmem:[%s830_s2 + $0x28] sm:$0xff] (!%p183_p3)  ;;  %v353_v21 = vld [vmem:[%s830_s2 + $0x30] sm:$0xff] (!%p183_p3)  ;;  %v681_v31 = vmov (!%p183_p3), 0.0   ;;  %vm361_vm1 = vcmask (!%p183_p3), 523264  }
   0xe   : > { %268 = vrot.lane.b32.xlu0 (!%p183_p3), %v537_v2, %s676_s5  ;;  %303 = vrot.lane.b32.xlu1 (!%p183_p3), %v540_v3, %s676_s5  ;;  %v583_v16 = vpack.c.bf16 (!%p183_p3), %v352_v15, %v351_v14  ;;  %v354_v22 = vld [vmem:[%s830_s2 + $0x38] sm:$0xff] (!%p183_p3)  ;;  %v535_v35 = vld [vmem:[%s829_s1] ss:$0 sm:$0xff] (!%p183_p3) }
   0xf   : > { %578 = vmatpush3.bf16.msra.mxu0 (!%p183_p3), %v577_v9  ;;  %v586_v24 = vpack.c.bf16 (!%p183_p3), %v354_v22, %v353_v21  ;;  %573 = vmatprep.mubr.msk.f32.mxu0 (!%p183_p3), %vm680_vm0, %v681_v31  ;;  %v538_v38 = vld [vmem:[%s829_s1 + $0x3] ss:$0 sm:$0xff] (!%p183_p3)  ;;  %v541_v43 = vld [vmem:[%s829_s1 + $0x6] ss:$0 sm:$0xff] (!%p183_p3)  ;;  %v544_v55 = vld [vmem:[%s831_s3] ss:$0 sm:$0xff] (!%p183_p3) }
  0x10   : > { %s844_s16 = smov (!%p215_p5, %s661_s16), 1  ;;  %s846_s15 = smov (!%p217_p6, %s657_s15), 1  ;;  %579 = vmatprep.subr.bf16.mxu0 %v677_v8 }
  0x11   : > { %s530_s10 = sshll.u32 %s846_s15, 1  ;;  %s531_s11 = sshll.u32 %s844_s16, 2 }
  0x12   : > { %324 = vrot.lane.b32.xlu0 %v542_v4, %s675_s24  ;;  %338 = vrot.lane.b32.xlu1 %v543_v5, %s676_s5  ;;  %s221_s12 = sadd.s32 %s531_s11, %s530_s10  ;;  %s533_s29 = sshll.u32 %s844_s16, 1 }
  0x13   : > { %s532_s24 = sshll.u32 %s221_s12, 3  ;;  %581 = vmatpush3.bf16.msra.mxu0 %v580_v12  ;;  %s229_s30 = sadd.s32 %s533_s29, %s846_s15 }
  0x14   : > { %s223_s5 = scalar_lea.vmem %s828_s0, %s532_s24  ;;  %582 = vmatprep.subr.bf16.mxu0 %v677_v8 }
  0x15   : > { %v242_v13 = vld [vmem:[%s223_s5] sm:$0xff] }
  0x16   : > { %v277_v18 = vld [vmem:[%s223_s5 + $0x1] sm:$0xff]  ;;  %v247_v36 = vmul.f32 %v535_v35, %v242_v13 }
  0x17   : > { %584 = vmatpush3.bf16.msra.mxu0 %v583_v16  ;;  %v312_v28 = vld [vmem:[%s223_s5 + $0x2] sm:$0xff]  ;;  %v282_v40 = vmul.f32 %v538_v38, %v277_v18  ;;  %s534_s5 = sshll.u32 %s229_s30, 3 }
  0x18   : > { %585 = vmatprep.subr.bf16.mxu0 %v677_v8  ;;  %v317_v48 = vmul.f32 %v541_v43, %v312_v28  ;;  %s231_s10 = scalar_lea.vmem %s832_s4, %s534_s5 }
  0x1b   : > { %587 = vmatpush3.bf16.msra.mxu0 %v586_v24 }
  0x7c   : > { %v255_v17 = vpop.permute.xlu0 %254  ;;  %v290_v20 = vpop.permute.xlu1 %289 }
  0x7d   : > { %v257_v19 = vmul.f32 %v255_v17, %v242_v13  ;;  %v292_v23 = vmul.f32 %v290_v20, %v277_v18 }
  0x7f   : > { %259 = vrot.lane.b32.xlu0 %v257_v19, %s678_s14 }
  0x80   : > { %v269_v25 = vpop.permute.xlu0 %268  ;;  %v304_v27 = vpop.permute.xlu1 %303 }
  0x81   : > { %v271_v26 = vmul.f32 %v269_v25, %v242_v13  ;;  %v306_v29 = vmul.f32 %v304_v27, %v277_v18 }
  0x83   : > { %273 = vrot.lane.b32.xlu1 %v271_v26, %s679_s22  ;;  %294 = vrot.lane.b32.xlu0 %v292_v23, %s678_s14 }
  0x84   : > { %v325_v30 = vpop.permute.xlu0 %324  ;;  %v339_v33 = vpop.permute.xlu1 %338 }
  0x85   : > { %v327_v32 = vmul.f32 %v325_v30, %v312_v28  ;;  %v341_v34 = vmul.f32 %v339_v33, %v312_v28 }
  0x87   : > { %308 = vrot.lane.b32.xlu1 %v306_v29, %s679_s22  ;;  %329 = vrot.lane.b32.xlu0 %v327_v32, %s678_s14 }
  0x8b   : > { %343 = vrot.lane.b32.xlu1 %v341_v34, %s679_s22 }
  0xf1   : > { %v260_v37 = vpop.permute.xlu0 %259 }
  0xf2   : > { %v262_v39 = vadd.f32 %v260_v37, %v247_v36 }
  0xf5   : > { %v274_v41 = vpop.permute.xlu1 %273  ;;  %v295_v45 = vpop.permute.xlu0 %294 }
  0xf6   : > { %v276_v42 = vadd.f32 %v274_v41, %v262_v39 }
  0xf8   : > { %v283_v44 = vadd.f32 %v282_v40, %v276_v42 }
  0xf9   : > { %v309_v46 = vpop.permute.xlu1 %308  ;;  %v330_v50 = vpop.permute.xlu0 %329 }
  0xfa   : > { %v297_v47 = vadd.f32 %v295_v45, %v283_v44 }
  0xfc   : > { %v311_v49 = vadd.f32 %v309_v46, %v297_v47 }
  0xfd   : > { %v344_v52 = vpop.permute.xlu1 %343 }
  0xfe   : > { %v318_v51 = vadd.f32 %v317_v48, %v311_v49 }
 0x100   : > { %v332_v53 = vadd.f32 %v330_v50, %v318_v51 }
 0x102   : > { %v346_v54 = vadd.f32 %v344_v52, %v332_v53 }
 0x104   : > { %574 = vmatmul.mubr.msk.f32.vlgmr.msra.gmra.mrb[0].mxu0 %vm361_vm1, %v346_v54 }
 0x1d7   : > { %v431_v56 = vpop.f32.mrb[0].mxu0 }
 0x1d8   : > { %v432_v57 = vadd.f32 %v544_v55, %v431_v56  ;;  %v575_v58 = vpop.f32.mrb[1].mxu0 }
 0x1da   : > { %435 = vst [vmem:[%s231_s10] sm:$0xff] %v432_v57 }
 0x1db PF: > { %s14_s19 = sadd.s32 1, %s673_s19   ;;  %s833_s15 = smov %s665_s17 }
 0x1dc   : > { %p11_p7 = scmp.ge.s32.totalorder %s14_s19, 6   ;;  %s834_s16 = smov %s669_s18 }
 0x1dd   : > { %s835_s17 = smov %s838_s20  ;;  %s836_s18 = smov %s842_s21 }
 0x1de   :  { %13 = sbr.rel (!%p11_p7) target bundleno = 3 (0x3), region = 66 }

</bundles_post_ra>
